<compile_context>
chip_gen: v5e
topology: v5e:2x2
jax: 0.10.0
libtpu: 0.0.40
codegen_flags: <defaults>
</compile_context>

<pallas_src>
import functools
import math

import jax
import jax.numpy as jnp
from jax.experimental import pallas as pl
from jax.experimental.pallas import tpu as pltpu


def _round_up(x, m):
    return ((x + m - 1) // m) * m


def cope_forward_kernel(x_ref, w_ref, b_ref, pt_ref, out_ref, acc_ref, *,
                        seen_c, matmul_dtype):
    """Grid = (row tiles [parallel], K tiles [arbitrary, reduction axis last]).

    x_ref  : (TM, TK)       flattened input tile (stored dtype; cast in-kernel if requested)
    w_ref  : (TK, ND)       linear-weight tile
    b_ref  : (1, ND)        linear bias (f32)
    pt_ref : (ND, SEEN_C)   prototypes, pre-transposed in the wrapper (plain NN contraction)
    out_ref: (TM, NC_PAD)   one-hot predictions, lane-padded to a 128 multiple (unmasked store)
    acc_ref: (TM, ND)       f32 accumulator scratch, resident across the K axis
    """
    k = pl.program_id(1)

    # Feature-extractor partial GEMM on the MXU. Any cast is per-tile, in-kernel, so the
    # wrapper never makes an extra HBM pass over x.
    partial = jnp.dot(x_ref[...].astype(matmul_dtype),
                      w_ref[...].astype(matmul_dtype),
                      preferred_element_type=jnp.float32)

    # Fold zero-init into the first accumulation (no separate zero-fill pass).
    @pl.when(k == 0)
    def _first():
        acc_ref[...] = partial

    @pl.when(k > 0)
    def _accum():
        acc_ref[...] += partial

    @pl.when(k == pl.num_programs(1) - 1)
    def _finalize():
        feat = acc_ref[...] + b_ref[...]                       # (TM, ND)

        # torch F.normalize(p=2, dim=1): x / max(||x||, eps), eps=1e-12,
        # implemented as feat * rsqrt(max(sumsq, eps^2)) (EUP rsqrt, no VALU divide).
        sumsq = jnp.sum(feat * feat, axis=1, keepdims=True)
        feat = feat * jax.lax.rsqrt(jnp.maximum(sumsq, 1e-24))

        # Similarity to prototypes: plain (TM, ND) @ (ND, SEEN_C) contraction.
        sims = jnp.dot(feat, pt_ref[...], preferred_element_type=jnp.float32)

        # argmax with first-index tie-breaking (matches torch .min(0) on -sims).
        col = jax.lax.broadcasted_iota(jnp.int32, sims.shape, 1)
        max_val = jnp.max(sims, axis=1, keepdims=True)
        cand = jnp.where(sims == max_val, col, seen_c)         # sentinel past valid range
        pred = jnp.min(cand, axis=1, keepdims=True)            # (TM, 1) int32

        # Lane-dense one-hot: NC_PAD is a multiple of 128 -> single unmasked store per tile.
        out_col = jax.lax.broadcasted_iota(jnp.int32, out_ref.shape, 1)
        out_ref[...] = (out_col == pred).astype(out_ref.dtype)


def cope_forward(x, w, b, prototypes, n_classes, *, matmul_dtype=jnp.float32,
                 _tile_m=None, _tile_k=None):
    """x: (B, C, H, W); w: (D, ND); b: (ND,); prototypes: (seen_c, ND) (class c -> row c)."""
    ns = x.shape[0]
    d = math.prod(x.shape[1:])
    nd = w.shape[1]
    seen_c = prototypes.shape[0]

    if seen_c == 0:
        # No seen classes yet: uniform output (matches the PyTorch early-return).
        return jnp.full((ns, n_classes), 1.0 / n_classes, dtype=jnp.float32)

    # ---- operands: no wrapper-side pad or dtype pass over x -----------------
    x_flat = x.reshape(ns, d)                    # free layout change for contiguous NCHW
    b2 = b.reshape(1, nd).astype(jnp.float32)
    pt_t = prototypes.astype(jnp.float32).T      # (nd, seen_c): NN contraction in finalize
    nc_pad = _round_up(n_classes, 128)           # lane-dense one-hot output
    itemsize = jnp.dtype(x_flat.dtype).itemsize

    # ---- generation-aware VMEM budget ---------------------------------------
    try:
        vmem_cap = int(pltpu.get_tpu_info().vmem_capacity_bytes)
    except Exception:
        vmem_cap = 64 * 2**20                    # conservative (v7x has 64 MiB physical)
    tile_budget = min(vmem_cap // 2, 24 * 2**20)

    def est_bytes(tm, tk):
        return (2 * tm * tk * itemsize           # x tile, double-buffered
                + 2 * tk * nd * itemsize         # w tile, double-buffered (worst case)
                + tm * nd * 4                    # f32 accumulator scratch
                + 2 * tm * nc_pad * 4            # one-hot output tile, double-buffered
                + nd * seen_c * 4 + nd * 4)      # prototypes + bias (resident)

    # ---- tile selection ------------------------------------------------------
    # Rows: aim for >= 2 balanced row tiles once the batch is large enough (v7x megacore
    # shards the "parallel" axis), multiples of 8 for (8,128)-aligned layouts, cap 512.
    if ns <= 8:
        tile_m = ns                              # block dim == full array dim: always legal
    else:
        tile_m = min(512, _round_up(pl.cdiv(ns, 2), 8))

    # K: prefer the whole flattened feature dim (K axis collapses -> W fetched exactly
    # once and no per-K accumulator traffic); otherwise the largest 128-multiple divisor
    # of d that fits the budget.
    if est_bytes(tile_m, d) <= tile_budget:
        tile_k = d
    else:
        tile_k = next((c for c in (4096, 2048, 1024, 512, 256, 128)
                       if d % c == 0 and est_bytes(tile_m, c) <= tile_budget), None)
        if tile_k is None:
            tile_k = next((c for c in (512, 256, 128) if d % c == 0), d)
            while tile_m > 8 and est_bytes(tile_m, tile_k) > tile_budget:
                tile_m = max(8, _round_up(tile_m // 2, 8))

    if _tile_m is not None:                      # test/debug overrides
        assert _tile_m == ns or _tile_m % 8 == 0
        tile_m = _tile_m
    if _tile_k is not None:
        assert _tile_k == d or (d % _tile_k == 0 and _tile_k % 128 == 0)
        tile_k = _tile_k

    n_m = pl.cdiv(ns, tile_m)                    # ragged last row tile: rows are independent
    n_k = pl.cdiv(d, tile_k)                     # and pad rows never reach the returned output
    assert d % tile_k == 0                       # K tiles must be exact (no garbage in reduce)

    vmem_limit = int(min(vmem_cap, max(16 * 2**20, 2 * est_bytes(tile_m, tile_k))))

    kernel = functools.partial(cope_forward_kernel, seen_c=seen_c, matmul_dtype=matmul_dtype)

    out = pl.pallas_call(
        kernel,
        out_shape=jax.ShapeDtypeStruct((ns, nc_pad), jnp.float32),
        grid_spec=pltpu.PrefetchScalarGridSpec(
            num_scalar_prefetch=0,
            grid=(n_m, n_k),
            in_specs=[
                pl.BlockSpec((tile_m, tile_k), lambda i, k: (i, k)),   # x tile
                pl.BlockSpec((tile_k, nd), lambda i, k: (k, 0)),       # w tile (once if n_k==1)
                pl.BlockSpec((1, nd), lambda i, k: (0, 0)),            # bias (resident)
                pl.BlockSpec((nd, seen_c), lambda i, k: (0, 0)),       # prototypes^T (resident)
            ],
            out_specs=pl.BlockSpec((tile_m, nc_pad), lambda i, k: (i, 0)),
            scratch_shapes=[pltpu.VMEM((tile_m, nd), jnp.float32)],
        ),
        compiler_params=pltpu.CompilerParams(
            dimension_semantics=("parallel", "arbitrary"),
            vmem_limit_bytes=vmem_limit,
        ),
    )(x_flat, w, b2, pt_t)

    return out[:, :n_classes]


def reference_forward(x, w, b, prototypes, n_classes):
    """Pure-JAX f32 reference matching the PyTorch forward. Returns (one_hot, sims)."""
    ns = x.shape[0]
    feat = x.reshape(ns, -1) @ w + b
    norm = jnp.sqrt(jnp.sum(feat * feat, axis=1, keepdims=True))
    feat = feat / jnp.maximum(norm, 1e-12)
    sims = feat @ prototypes.T                       # (ns, seen_c)
    pred = jnp.argmax(sims, axis=1)                  # argmin of -sims, first index on ties
    return jax.nn.one_hot(pred, n_classes, dtype=jnp.float32), sims


if __name__ == "__main__":
    # Small shapes consistent with the module: NCHW input, n_feat embedding, n_classes output.
    B, C, H, W = 2, 4, 16, 16
    n_feat = 32
    n_classes = 10
    seen_c = 6                # number of classes with a prototype in class_mem

    key = jax.random.PRNGKey(0)
    kx, kw, kb, kp, kx2 = jax.random.split(key, 5)

    x = jax.random.normal(kx, (B, C, H, W), dtype=jnp.float32)

    # Deterministic synthetic parameters for the feature extractor (args.net):
    # TODO(synk): args.net is user-provided in CoPE; a flatten+Linear stand-in is used here.
    D = C * H * W
    w = jax.random.normal(kw, (D, n_feat), dtype=jnp.float32) * (1.0 / jnp.sqrt(D))
    b = jax.random.normal(kb, (n_feat,), dtype=jnp.float32) * 0.01

    # Prototypes (one per seen class), L2-normalized like CoPE keeps them.
    protos = jax.random.normal(kp, (seen_c, n_feat), dtype=jnp.float32)
    protos = protos / jnp.linalg.norm(protos, axis=1, keepdims=True)

    ref_out, ref_sims = reference_forward(x, w, b, protos, n_classes)

    # 1) default f32 path: must match the f32 reference (identical argmax / one-hot).
    out_f32 = jax.block_until_ready(cope_forward(x, w, b, protos, n_classes))
    assert out_f32.shape == (B, n_classes)
    assert jnp.allclose(out_f32, ref_out, atol=1e-5), (out_f32, ref_out)

    # 2) bf16 in-kernel-cast path (f32 accumulate): prediction must be optimal within a tiny
    #    similarity tolerance (accepted deviation: bf16 rounding may flip near-exact ties).
    out_bf16 = jax.block_until_ready(
        cope_forward(x, w, b, protos, n_classes, matmul_dtype=jnp.bfloat16))
    assert out_bf16.shape == (B, n_classes)
    assert jnp.allclose(jnp.sum(out_bf16, axis=1), 1.0)
    pred_bf16 = jnp.argmax(out_bf16, axis=1)
    picked_sim = ref_sims[jnp.arange(B), pred_bf16]
    assert jnp.all(picked_sim >= jnp.max(ref_sims, axis=1) - 1e-2), (picked_sim, ref_sims)

    # 3) larger batch: 2 balanced row tiles with a ragged last block (no wrapper pad / cast).
    B2 = 300
    x2 = jax.random.normal(kx2, (B2, C, H, W), dtype=jnp.float32)
    ref2, _ = reference_forward(x2, w, b, protos, n_classes)
    out2 = jax.block_until_ready(cope_forward(x2, w, b, protos, n_classes))
    assert out2.shape == (B2, n_classes)
    assert jnp.allclose(out2, ref2, atol=1e-5)

    # 4) explicitly exercise the K-reduction (accumulator) path and a 3-way ragged row grid.
    out3 = jax.block_until_ready(
        cope_forward(x2, w, b, protos, n_classes, _tile_m=128, _tile_k=256))
    assert out3.shape == (B2, n_classes)
    assert jnp.allclose(out3, ref2, atol=1e-5)

    print("KERNEL_OK")
</pallas_src>

<mosaic_0001>
module attributes {stable_mosaic.version = 11 : i64} {
  func.func @cope_forward_kernel(%arg0: i32, %arg1: i32, %arg2: memref<2x1024xf32, #tpu.memory_space<vmem>>, %arg3: memref<1024x32xf32, #tpu.memory_space<vmem>>, %arg4: memref<1x32xf32, #tpu.memory_space<vmem>>, %arg5: memref<32x6xf32, #tpu.memory_space<vmem>>, %arg6: memref<2x128xf32, #tpu.memory_space<vmem>>, %arg7: memref<2x32xf32, #tpu.memory_space<vmem>>) attributes {dimension_semantics = [#tpu.dimension_semantics<parallel>, #tpu.dimension_semantics<arbitrary>], iteration_bounds = array<i64: 1, 1>, scalar_prefetch = 0 : i64, scratch_operands = 1 : i64, tpu.core_type = #tpu.core_type<tc>, window_params = [{transform_indices = @transform_0, window_bounds = array<i64: 2, 1024>}, {transform_indices = @transform_1, window_bounds = array<i64: 1024, 32>}, {pipeline_mode = #tpu.pipeline_mode<synchronous>, transform_indices = @transform_2, window_bounds = array<i64: 1, 32>}, {pipeline_mode = #tpu.pipeline_mode<synchronous>, transform_indices = @transform_3, window_bounds = array<i64: 32, 6>}, {transform_indices = @transform_4, window_bounds = array<i64: 2, 128>}]} {
    %c0 = arith.constant 0 : index
    %c0_0 = arith.constant 0 : index
    %0 = vector.load %arg2[%c0, %c0_0] : memref<2x1024xf32, #tpu.memory_space<vmem>>, vector<2x1024xf32>
    %c0_1 = arith.constant 0 : index
    %c0_2 = arith.constant 0 : index
    %1 = vector.load %arg3[%c0_1, %c0_2] : memref<1024x32xf32, #tpu.memory_space<vmem>>, vector<1024x32xf32>
    %cst = arith.constant dense<0.000000e+00> : vector<2x32xf32>
    %2 = tpu.matmul %0, %1, %cst {dimension_numbers = #tpu.dot_dimension_numbers<[1], [0], [0], [1], [0, 0, 1, 1], [], []>} : vector<2x1024xf32>, vector<1024x32xf32>, vector<2x32xf32> -> vector<2x32xf32>
    %c0_i32 = arith.constant 0 : i32
    %3 = arith.cmpi eq, %arg1, %c0_i32 : i32
    %4 = arith.extui %3 : i1 to i32
    %c0_i32_3 = arith.constant 0 : i32
    %5 = arith.cmpi ne, %4, %c0_i32_3 : i32
    scf.if %5 {
      %c0_8 = arith.constant 0 : index
      %c0_9 = arith.constant 0 : index
      %12 = vector.load %arg7[%c0_8, %c0_9] : memref<2x32xf32, #tpu.memory_space<vmem>>, vector<2x32xf32>
      tpu.vector_store %arg7[%c0_8, %c0_9], %2 {strides = array<i32>} : memref<2x32xf32, #tpu.memory_space<vmem>>, vector<2x32xf32>,
    } else {
    }
    %c0_i32_4 = arith.constant 0 : i32
    %6 = arith.cmpi sgt, %arg1, %c0_i32_4 : i32
    %7 = arith.extui %6 : i1 to i32
    %c0_i32_5 = arith.constant 0 : i32
    %8 = arith.cmpi ne, %7, %c0_i32_5 : i32
    scf.if %8 {
      %c0_8 = arith.constant 0 : index
      %c0_9 = arith.constant 0 : index
      %12 = vector.load %arg7[%c0_8, %c0_9] : memref<2x32xf32, #tpu.memory_space<vmem>>, vector<2x32xf32>
      %13 = arith.addf %12, %2 : vector<2x32xf32>
      %c0_10 = arith.constant 0 : index
      %c0_11 = arith.constant 0 : index
      %14 = vector.load %arg7[%c0_10, %c0_11] : memref<2x32xf32, #tpu.memory_space<vmem>>, vector<2x32xf32>
      tpu.vector_store %arg7[%c0_10, %c0_11], %13 {strides = array<i32>} : memref<2x32xf32, #tpu.memory_space<vmem>>, vector<2x32xf32>,
    } else {
    }
    %c0_i32_6 = arith.constant 0 : i32
    %9 = arith.cmpi eq, %arg1, %c0_i32_6 : i32
    %10 = arith.extui %9 : i1 to i32
    %c0_i32_7 = arith.constant 0 : i32
    %11 = arith.cmpi ne, %10, %c0_i32_7 : i32
    scf.if %11 {
      %c0_8 = arith.constant 0 : index
      %c0_9 = arith.constant 0 : index
      %12 = vector.load %arg7[%c0_8, %c0_9] : memref<2x32xf32, #tpu.memory_space<vmem>>, vector<2x32xf32>
      %c0_10 = arith.constant 0 : index
      %c0_11 = arith.constant 0 : index
      %13 = vector.load %arg4[%c0_10, %c0_11] : memref<1x32xf32, #tpu.memory_space<vmem>>, vector<1x32xf32>
      %14 = vector.broadcast %13 : vector<1x32xf32> to vector<2x32xf32>
      %15 = arith.addf %12, %14 : vector<2x32xf32>
      %16 = arith.mulf %15, %15 : vector<2x32xf32>
      %cst_12 = arith.constant dense<0.000000e+00> : vector<2xf32>
      %17 = vector.multi_reduction <add>, %16, %cst_12 [1] : vector<2x32xf32> to vector<2xf32>
      %18 = vector.shape_cast %17 : vector<2xf32> to vector<2x1xf32>
      %cst_13 = arith.constant 1.000000e-24 : f32
      %19 = vector.broadcast %cst_13 : f32 to vector<2x1xf32>
      %20 = arith.maximumf %18, %19 : vector<2x1xf32>
      %21 = math.rsqrt %20 : vector<2x1xf32>
      %22 = vector.broadcast %21 : vector<2x1xf32> to vector<2x32xf32>
      %23 = arith.mulf %15, %22 : vector<2x32xf32>
      %c0_14 = arith.constant 0 : index
      %c0_15 = arith.constant 0 : index
      %24 = vector.load %arg5[%c0_14, %c0_15] : memref<32x6xf32, #tpu.memory_space<vmem>>, vector<32x6xf32>
      %cst_16 = arith.constant dense<0.000000e+00> : vector<2x6xf32>
      %25 = tpu.matmul %23, %24, %cst_16 {dimension_numbers = #tpu.dot_dimension_numbers<[1], [0], [0], [1], [0, 0, 1, 1], [], []>} : vector<2x32xf32>, vector<32x6xf32>, vector<2x6xf32> -> vector<2x6xf32>
      %26 = tpu.iota {dimensions = array<i32: 1>} : vector<2x6xi32>
      %cst_17 = arith.constant dense<0xFF800000> : vector<2xf32>
      %27 = vector.multi_reduction <maximumf>, %25, %cst_17 [1] : vector<2x6xf32> to vector<2xf32>
      %28 = vector.shape_cast %27 : vector<2xf32> to vector<2x1xf32>
      %29 = vector.broadcast %28 : vector<2x1xf32> to vector<2x6xf32>
      %30 = arith.cmpf oeq, %25, %29 : vector<2x6xf32>
      %c6_i32 = arith.constant 6 : i32
      %31 = vector.broadcast %c6_i32 : i32 to vector<2x6xi32>
      %32 = arith.select %30, %26, %31 : vector<2x6xi1>, vector<2x6xi32>
      %cst_18 = arith.constant dense<2147483647> : vector<2xi32>
      %33 = vector.multi_reduction <minsi>, %32, %cst_18 [1] : vector<2x6xi32> to vector<2xi32>
      %34 = vector.shape_cast %33 : vector<2xi32> to vector<2x1xi32>
      %35 = tpu.iota {dimensions = array<i32: 1>} : vector<2x128xi32>
      %36 = vector.broadcast %34 : vector<2x1xi32> to vector<2x128xi32>
      %37 = arith.cmpi eq, %35, %36 : vector<2x128xi32>
      %38 = arith.extui %37 : vector<2x128xi1> to vector<2x128xi32>
      %39 = arith.sitofp %38 : vector<2x128xi32> to vector<2x128xf32>
      %c0_19 = arith.constant 0 : index
      %c0_20 = arith.constant 0 : index
      %40 = vector.load %arg6[%c0_19, %c0_20] : memref<2x128xf32, #tpu.memory_space<vmem>>, vector<2x128xf32>
      tpu.vector_store %arg6[%c0_19, %c0_20], %39 {strides = array<i32>} : memref<2x128xf32, #tpu.memory_space<vmem>>, vector<2x128xf32>,
    } else {
    }
    return
  }
  func.func @transform_0(%arg0: i32, %arg1: i32) -> (i32, i32) {
    %c0_i32 = arith.constant 0 : i32
    return %arg0, %arg1 : i32, i32
  }
  func.func @transform_1(%arg0: i32, %arg1: i32) -> (i32, i32) {
    %c0_i32 = arith.constant 0 : i32
    %c0_i32_0 = arith.constant 0 : i32
    return %arg1, %c0_i32 : i32, i32
  }
  func.func @transform_2(%arg0: i32, %arg1: i32) -> (i32, i32) {
    %c0_i32 = arith.constant 0 : i32
    %c0_i32_0 = arith.constant 0 : i32
    %c0_i32_1 = arith.constant 0 : i32
    return %c0_i32, %c0_i32_0 : i32, i32
  }
  func.func @transform_3(%arg0: i32, %arg1: i32) -> (i32, i32) {
    %c0_i32 = arith.constant 0 : i32
    %c0_i32_0 = arith.constant 0 : i32
    %c0_i32_1 = arith.constant 0 : i32
    return %c0_i32, %c0_i32_0 : i32, i32
  }
  func.func @transform_4(%arg0: i32, %arg1: i32) -> (i32, i32) {
    %c0_i32 = arith.constant 0 : i32
    %c0_i32_0 = arith.constant 0 : i32
    return %arg0, %c0_i32 : i32, i32
  }
}

</mosaic_0001>

<bundles_post_ra>
// kernel: tpu_custom_call.1
= control target key start
LH: loop header
LB: loop body
LE: loop exit
PB: predicated region body
PF: predicated region fallthrough
CT: control target
= control target key end

     0   :  { %s908_s0 = inlined_call_operand.vmem [shape: f32[2,1024], index: 0, kind: input, shape index: {}]   ;;  %s909_s1 = inlined_call_operand.vmem [shape: f32[1024,32], index: 1, kind: input, shape index: {}]   ;;  %s910_s2 = inlined_call_operand.vmem [shape: f32[1,32], index: 2, kind: input, shape index: {}]   ;;  %s911_s3 = inlined_call_operand.vmem [shape: f32[32,6], index: 3, kind: input, shape index: {}]   ;;  %s912_s4 = inlined_call_operand.hbm [shape: f32[2,128], index: 4, kind: output, shape index: {}]  }
   0x1   :  { %v35_v0 = vld [vmem:[%s909_s1 + $0x78] sm:$0xff]  ;;  %v34_v2 = vld [vmem:[%s909_s1 + $0x70] sm:$0xff]  ;;  %v33_v6 = vld [vmem:[%s909_s1 + $0x68] sm:$0xff] }
   0x2   :  { %v67_v1 = vld [vmem:[%s909_s1 + $0x178] sm:$0xff]  ;;  %169 = vmatpush.msra.mxu0 %v35_v0  ;;  %v66_v4 = vld [vmem:[%s909_s1 + $0x170] sm:$0xff]  ;;  %v65_v8 = vld [vmem:[%s909_s1 + $0x168] sm:$0xff] }
   0x3   :  { %209 = vmatpush.msra.mxu2 %v67_v1  ;;  %v51_v3 = vld [vmem:[%s909_s1 + $0xf8] sm:$0xff]  ;;  %v50_v7 = vld [vmem:[%s909_s1 + $0xf0] sm:$0xff]  ;;  %v49_v10 = vld [vmem:[%s909_s1 + $0xe8] sm:$0xff] }
   0x4   :  { %v83_v5 = vld [vmem:[%s909_s1 + $0x1f8] sm:$0xff]  ;;  %189 = vmatpush.msra.mxu1 %v51_v3  ;;  %170 = vmatpush.msra.mxu0 %v34_v2  ;;  %v82_v9 = vld [vmem:[%s909_s1 + $0x1f0] sm:$0xff]  ;;  %v32_v11 = vld [vmem:[%s909_s1 + $0x60] sm:$0xff] }
   0x5   :  { %229 = vmatpush.msra.mxu3 %v83_v5  ;;  %210 = vmatpush.msra.mxu2 %v66_v4  ;;  %v64_v12 = vld [vmem:[%s909_s1 + $0x160] sm:$0xff]  ;;  %v81_v13 = vld [vmem:[%s909_s1 + $0x1e8] sm:$0xff]  ;;  %v31_v16 = vld [vmem:[%s909_s1 + $0x58] sm:$0xff] }
   0x6   :  { %190 = vmatpush.msra.mxu1 %v50_v7  ;;  %171 = vmatpush.msra.mxu0 %v33_v6  ;;  %v48_v14 = vld [vmem:[%s909_s1 + $0xe0] sm:$0xff]  ;;  %v63_v17 = vld [vmem:[%s909_s1 + $0x158] sm:$0xff]  ;;  %v30_v20 = vld [vmem:[%s909_s1 + $0x50] sm:$0xff] }
   0x7   :  { %230 = vmatpush.msra.mxu3 %v82_v9  ;;  %211 = vmatpush.msra.mxu2 %v65_v8  ;;  %v80_v15 = vld [vmem:[%s909_s1 + $0x1e0] sm:$0xff]  ;;  %v47_v18 = vld [vmem:[%s909_s1 + $0xd8] sm:$0xff]  ;;  %v62_v21 = vld [vmem:[%s909_s1 + $0x150] sm:$0xff] }
   0x8   :  { %191 = vmatpush.msra.mxu1 %v49_v10  ;;  %172 = vmatpush.msra.mxu0 %v32_v11  ;;  %v79_v19 = vld [vmem:[%s909_s1 + $0x1d8] sm:$0xff]  ;;  %v46_v22 = vld [vmem:[%s909_s1 + $0xd0] sm:$0xff]  ;;  %v29_v24 = vld [vmem:[%s909_s1 + $0x48] sm:$0xff] }
   0x9   :  { %231 = vmatpush.msra.mxu3 %v81_v13  ;;  %212 = vmatpush.msra.mxu2 %v64_v12  ;;  %v78_v23 = vld [vmem:[%s909_s1 + $0x1d0] sm:$0xff]  ;;  %v61_v25 = vld [vmem:[%s909_s1 + $0x148] sm:$0xff]  ;;  %v28_v28 = vld [vmem:[%s909_s1 + $0x40] sm:$0xff] }
   0xa   :  { %192 = vmatpush.msra.mxu1 %v48_v14  ;;  %173 = vmatpush.msra.mxu0 %v31_v16  ;;  %v45_v26 = vld [vmem:[%s909_s1 + $0xc8] sm:$0xff]  ;;  %v60_v29 = vld [vmem:[%s909_s1 + $0x140] sm:$0xff]  ;;  %v27_v32 = vld [vmem:[%s909_s1 + $0x38] sm:$0xff] }
   0xb   :  { %232 = vmatpush.msra.mxu3 %v80_v15  ;;  %213 = vmatpush.msra.mxu2 %v63_v17  ;;  %v77_v27 = vld [vmem:[%s909_s1 + $0x1c8] sm:$0xff]  ;;  %v44_v30 = vld [vmem:[%s909_s1 + $0xc0] sm:$0xff]  ;;  %v59_v33 = vld [vmem:[%s909_s1 + $0x138] sm:$0xff] }
   0xc   :  { %193 = vmatpush.msra.mxu1 %v47_v18  ;;  %174 = vmatpush.msra.mxu0 %v30_v20  ;;  %v76_v31 = vld [vmem:[%s909_s1 + $0x1c0] sm:$0xff]  ;;  %v43_v34 = vld [vmem:[%s909_s1 + $0xb8] sm:$0xff]  ;;  %v26_v36 = vld [vmem:[%s909_s1 + $0x30] sm:$0xff] }
   0xd   :  { %233 = vmatpush.msra.mxu3 %v79_v19  ;;  %214 = vmatpush.msra.mxu2 %v62_v21  ;;  %v75_v35 = vld [vmem:[%s909_s1 + $0x1b8] sm:$0xff]  ;;  %v58_v37 = vld [vmem:[%s909_s1 + $0x130] sm:$0xff]  ;;  %v25_v40 = vld [vmem:[%s909_s1 + $0x28] sm:$0xff] }
   0xe   :  { %194 = vmatpush.msra.mxu1 %v46_v22  ;;  %175 = vmatpush.msra.mxu0 %v29_v24  ;;  %v42_v38 = vld [vmem:[%s909_s1 + $0xb0] sm:$0xff]  ;;  %v57_v41 = vld [vmem:[%s909_s1 + $0x128] sm:$0xff]  ;;  %v24_v44 = vld [vmem:[%s909_s1 + $0x20] sm:$0xff] }
   0xf   :  { %234 = vmatpush.msra.mxu3 %v78_v23  ;;  %215 = vmatpush.msra.mxu2 %v61_v25  ;;  %v74_v39 = vld [vmem:[%s909_s1 + $0x1b0] sm:$0xff]  ;;  %v41_v42 = vld [vmem:[%s909_s1 + $0xa8] sm:$0xff]  ;;  %v56_v45 = vld [vmem:[%s909_s1 + $0x120] sm:$0xff] }
  0x10   :  { %195 = vmatpush.msra.mxu1 %v45_v26  ;;  %176 = vmatpush.msra.mxu0 %v28_v28  ;;  %v73_v43 = vld [vmem:[%s909_s1 + $0x1a8] sm:$0xff]  ;;  %v40_v46 = vld [vmem:[%s909_s1 + $0xa0] sm:$0xff]  ;;  %v23_v48 = vld [vmem:[%s909_s1 + $0x18] sm:$0xff] }
  0x11   :  { %235 = vmatpush.msra.mxu3 %v77_v27  ;;  %216 = vmatpush.msra.mxu2 %v60_v29  ;;  %v72_v47 = vld [vmem:[%s909_s1 + $0x1a0] sm:$0xff]  ;;  %v55_v49 = vld [vmem:[%s909_s1 + $0x118] sm:$0xff]  ;;  %v22_v52 = vld [vmem:[%s909_s1 + $0x10] sm:$0xff] }
  0x12   :  { %196 = vmatpush.msra.mxu1 %v44_v30  ;;  %177 = vmatpush.msra.mxu0 %v27_v32  ;;  %v39_v50 = vld [vmem:[%s909_s1 + $0x98] sm:$0xff]  ;;  %v54_v53 = vld [vmem:[%s909_s1 + $0x110] sm:$0xff]  ;;  %v21_v56 = vld [vmem:[%s909_s1 + $0x8] sm:$0xff] }
  0x13   :  { %236 = vmatpush.msra.mxu3 %v76_v31  ;;  %217 = vmatpush.msra.mxu2 %v59_v33  ;;  %v71_v51 = vld [vmem:[%s909_s1 + $0x198] sm:$0xff]  ;;  %v38_v54 = vld [vmem:[%s909_s1 + $0x90] sm:$0xff]  ;;  %v53_v57 = vld [vmem:[%s909_s1 + $0x108] sm:$0xff] }
  0x14   :  { %197 = vmatpush.msra.mxu1 %v43_v34  ;;  %178 = vmatpush.msra.mxu0 %v26_v36  ;;  %v70_v55 = vld [vmem:[%s909_s1 + $0x190] sm:$0xff]  ;;  %v37_v58 = vld [vmem:[%s909_s1 + $0x88] sm:$0xff]  ;;  %v20_v60 = vld [vmem:[%s909_s1] sm:$0xff] }
  0x15   :  { %237 = vmatpush.msra.mxu3 %v75_v35  ;;  %218 = vmatpush.msra.mxu2 %v58_v37  ;;  %v69_v59 = vld [vmem:[%s909_s1 + $0x188] sm:$0xff]  ;;  %v52_v61 = vld [vmem:[%s909_s1 + $0x100] sm:$0xff]  ;;  %v99_v62 = vld [vmem:[%s909_s1 + $0x278] sm:$0xff] }
  0x16   :  { %198 = vmatpush.msra.mxu1 %v42_v38  ;;  %179 = vmatpush.msra.mxu0 %v25_v40  ;;  %v131_v63 = vld [vmem:[%s909_s1 + $0x378] sm:$0xff]  ;;  %v36_v0 = vld [vmem:[%s909_s1 + $0x80] sm:$0xff]  ;;  %v98_v2 = vld [vmem:[%s909_s1 + $0x270] sm:$0xff] }
  0x17   :  { %238 = vmatpush.msra.mxu3 %v74_v39  ;;  %219 = vmatpush.msra.mxu2 %v57_v41  ;;  %v68_v1 = vld [vmem:[%s909_s1 + $0x180] sm:$0xff]  ;;  %v115_v3 = vld [vmem:[%s909_s1 + $0x2f8] sm:$0xff]  ;;  %v130_v4 = vld [vmem:[%s909_s1 + $0x370] sm:$0xff] }
  0x18   :  { %199 = vmatpush.msra.mxu1 %v41_v42  ;;  %180 = vmatpush.msra.mxu0 %v24_v44  ;;  %v147_v5 = vld [vmem:[%s909_s1 + $0x3f8] sm:$0xff]  ;;  %v97_v6 = vld [vmem:[%s909_s1 + $0x268] sm:$0xff]  ;;  %v114_v7 = vld [vmem:[%s909_s1 + $0x2f0] sm:$0xff] }
  0x19   :  { %239 = vmatpush.msra.mxu3 %v73_v43  ;;  %220 = vmatpush.msra.mxu2 %v56_v45  ;;  %v129_v8 = vld [vmem:[%s909_s1 + $0x368] sm:$0xff]  ;;  %v146_v9 = vld [vmem:[%s909_s1 + $0x3f0] sm:$0xff]  ;;  %v96_v10 = vld [vmem:[%s909_s1 + $0x260] sm:$0xff] }
  0x1a   :  { %200 = vmatpush.msra.mxu1 %v40_v46  ;;  %181 = vmatpush.msra.mxu0 %v23_v48  ;;  %v113_v11 = vld [vmem:[%s909_s1 + $0x2e8] sm:$0xff]  ;;  %v18_v12 = vld [vmem:[%s908_s0] sm:$0xff]  ;;  %v95_v15 = vld [vmem:[%s909_s1 + $0x258] sm:$0xff] }
  0x1b   :  { %240 = vmatpush.msra.mxu3 %v72_v47  ;;  %221 = vmatpush.msra.mxu2 %v55_v49  ;;  %v128_v13 = vld [vmem:[%s909_s1 + $0x360] sm:$0xff]  ;;  %v145_v14 = vld [vmem:[%s909_s1 + $0x3e8] sm:$0xff]  ;;  %150 = vst [vmem:[#allocation1] ss:$4 sm:$0xff] %v18_v12  ;;  %v127_v17 = vld [vmem:[%s909_s1 + $0x358] sm:$0xff] }
  0x1c   :  { %201 = vmatpush.msra.mxu1 %v39_v50  ;;  %182 = vmatpush.msra.mxu0 %v22_v52  ;;  %v112_v16 = vld [vmem:[%s909_s1 + $0x2e0] sm:$0xff]  ;;  %v94_v19 = vld [vmem:[%s909_s1 + $0x250] sm:$0xff]  ;;  %v111_v20 = vld [vmem:[%s909_s1 + $0x2d8] sm:$0xff] }
  0x1d   :  { %241 = vmatpush.msra.mxu3 %v71_v51  ;;  %222 = vmatpush.msra.mxu2 %v54_v53  ;;  %v144_v18 = vld [vmem:[%s909_s1 + $0x3e0] sm:$0xff]  ;;  %v126_v21 = vld [vmem:[%s909_s1 + $0x350] sm:$0xff]  ;;  %v143_v22 = vld [vmem:[%s909_s1 + $0x3d8] sm:$0xff] }
  0x1e   :  { %202 = vmatpush.msra.mxu1 %v38_v54  ;;  %183 = vmatpush.msra.mxu0 %v21_v56  ;;  %v93_v23 = vld [vmem:[%s909_s1 + $0x248] sm:$0xff]  ;;  %v110_v24 = vld [vmem:[%s909_s1 + $0x2d0] sm:$0xff]  ;;  %v92_v28 = vld [vmem:[%s909_s1 + $0x240] sm:$0xff] }
  0x1f   :  { %242 = vmatpush.msra.mxu3 %v70_v55  ;;  %223 = vmatpush.msra.mxu2 %v53_v57  ;;  %v125_v25 = vld [vmem:[%s909_s1 + $0x348] sm:$0xff]  ;;  %v142_v26 = vld [vmem:[%s909_s1 + $0x3d0] sm:$0xff]  ;;  %v124_v30 = vld [vmem:[%s909_s1 + $0x340] sm:$0xff] }
  0x20   :  { %203 = vmatpush.msra.mxu1 %v37_v58  ;;  %184 = vmatpush.msra.mxu0 %v20_v60  ;;  %v19_v27 = vld [vmem:[%s908_s0 + $0x8] sm:$0xff]  ;;  %v91_v32 = vld [vmem:[%s909_s1 + $0x238] sm:$0xff]  ;;  %v108_v33 = vld [vmem:[%s909_s1 + $0x2c0] sm:$0xff] }
  0x21   :  { %243 = vmatpush.msra.mxu3 %v69_v59  ;;  %224 = vmatpush.msra.mxu2 %v52_v61  ;;  %v109_v29 = vld [vmem:[%s909_s1 + $0x2c8] sm:$0xff]  ;;  %152 = vst [vmem:[#allocation1 + $0x20] ss:$4 sm:$0xff] %v19_v27  ;;  %v123_v34 = vld [vmem:[%s909_s1 + $0x338] sm:$0xff]  ;;  %v140_v35 = vld [vmem:[%s909_s1 + $0x3c0] sm:$0xff] }
  0x22   :  { %249 = vmatpush.msrb.mxu0 %v99_v62  ;;  %204 = vmatpush.msra.mxu1 %v36_v0  ;;  %v141_v31 = vld [vmem:[%s909_s1 + $0x3c8] sm:$0xff] }
  0x23   :  { %289 = vmatpush.msrb.mxu2 %v131_v63  ;;  %244 = vmatpush.msra.mxu3 %v68_v1 }
  0x24   :  { %250 = vmatpush.msrb.mxu0 %v98_v2  ;;  %269 = vmatpush.msrb.mxu1 %v115_v3 }
  0x25   :  { %290 = vmatpush.msrb.mxu2 %v130_v4  ;;  %309 = vmatpush.msrb.mxu3 %v147_v5 }
  0x26   :  { %251 = vmatpush.msrb.mxu0 %v97_v6  ;;  %270 = vmatpush.msrb.mxu1 %v114_v7 }
  0x27   :  { %291 = vmatpush.msrb.mxu2 %v129_v8  ;;  %310 = vmatpush.msrb.mxu3 %v146_v9 }
  0x28   :  { %252 = vmatpush.msrb.mxu0 %v96_v10  ;;  %271 = vmatpush.msrb.mxu1 %v113_v11 }
  0x29   :  { %292 = vmatpush.msrb.mxu2 %v128_v13  ;;  %311 = vmatpush.msrb.mxu3 %v145_v14 }
  0x2a   :  { %253 = vmatpush.msrb.mxu0 %v95_v15  ;;  %272 = vmatpush.msrb.mxu1 %v112_v16 }
  0x2b   :  { %293 = vmatpush.msrb.mxu2 %v127_v17  ;;  %312 = vmatpush.msrb.mxu3 %v144_v18 }
  0x2c   :  { %254 = vmatpush.msrb.mxu0 %v94_v19  ;;  %273 = vmatpush.msrb.mxu1 %v111_v20 }
  0x2d   :  { %294 = vmatpush.msrb.mxu2 %v126_v21  ;;  %313 = vmatpush.msrb.mxu3 %v143_v22 }
  0x2e   :  { %255 = vmatpush.msrb.mxu0 %v93_v23  ;;  %274 = vmatpush.msrb.mxu1 %v110_v24 }
  0x2f   :  { %295 = vmatpush.msrb.mxu2 %v125_v25  ;;  %314 = vmatpush.msrb.mxu3 %v142_v26 }
  0x30   :  { %256 = vmatpush.msrb.mxu0 %v92_v28  ;;  %275 = vmatpush.msrb.mxu1 %v109_v29 }
  0x31   :  { %9 = vsyncpa [#allocation4], 0  ;;  %296 = vmatpush.msrb.mxu2 %v124_v30  ;;  %315 = vmatpush.msrb.mxu3 %v141_v31  ;;  %v90_v36 = vld [vmem:[%s909_s1 + $0x230] sm:$0xff]  ;;  %v107_v37 = vld [vmem:[%s909_s1 + $0x2b8] sm:$0xff]  ;;  %vm333_vm0 = vcmask 254976   ;;  %vm373_vm4 = vcmask 261120  }
  0x32   :  { %257 = vmatpush.msrb.mxu0 %v91_v32  ;;  %276 = vmatpush.msrb.mxu1 %v108_v33  ;;  %v122_v38 = vld [vmem:[%s909_s1 + $0x330] sm:$0xff]  ;;  %v139_v39 = vld [vmem:[%s909_s1 + $0x3b8] sm:$0xff]  ;;  %v89_v40 = vld [vmem:[%s909_s1 + $0x228] sm:$0xff]  ;;  %vm399_vm5 = vcmask 41984   ;;  %s431_s23 = sshll.u32 %s912_s4, 4  ;;  %s432_s23 = int_to_ptr.hbm [resolvable:$true] %s431_s23 }
  0x33   :  { %297 = vmatpush.msrb.mxu2 %v123_v34  ;;  %316 = vmatpush.msrb.mxu3 %v140_v35  ;;  %v106_v41 = vld [vmem:[%s909_s1 + $0x2b0] sm:$0xff]  ;;  %v121_v42 = vld [vmem:[%s909_s1 + $0x328] sm:$0xff]  ;;  %v88_v45 = vld [vmem:[%s909_s1 + $0x220] sm:$0xff] }
  0x34   :  { %258 = vmatpush.msrb.mxu0 %v90_v36  ;;  %277 = vmatpush.msrb.mxu1 %v107_v37  ;;  %v138_v43 = vld [vmem:[%s909_s1 + $0x3b0] sm:$0xff]  ;;  %v105_v46 = vld [vmem:[%s909_s1 + $0x2a8] sm:$0xff]  ;;  %v120_v47 = vld [vmem:[%s909_s1 + $0x320] sm:$0xff] }
  0x35   :  { %298 = vmatpush.msrb.mxu2 %v122_v38  ;;  %317 = vmatpush.msrb.mxu3 %v139_v39  ;;  %v155_v44 = vld.sshfl [vmem:[#allocation1 + $0x10] sm:$0xff pattern:$0x73625140]  ;;  %v137_v48 = vld [vmem:[%s909_s1 + $0x3a8] sm:$0xff]  ;;  %v87_v51 = vld [vmem:[%s909_s1 + $0x218] sm:$0xff] }
  0x36   :  { %259 = vmatpush.msrb.mxu0 %v89_v40  ;;  %278 = vmatpush.msrb.mxu1 %v106_v41  ;;  %v153_v49 = vld.sshfl [vmem:[#allocation1] sm:$0xff pattern:$0x73625140]  ;;  %v156_v50 = vld.sshfl [vmem:[#allocation1 + $0x18] sm:$0xff pattern:$0x73625140] }
  0x37   :  { %299 = vmatpush.msrb.mxu2 %v121_v42  ;;  %318 = vmatpush.msrb.mxu3 %v138_v43  ;;  %v104_v52 = vld [vmem:[%s909_s1 + $0x2a0] sm:$0xff]  ;;  %v119_v53 = vld [vmem:[%s909_s1 + $0x318] sm:$0xff]  ;;  %v154_v55 = vld.sshfl [vmem:[#allocation1 + $0x8] sm:$0xff pattern:$0x73625140] }
  0x38   :  { %225 = vmatmul.f32.vlgmr.msra.gmra.mxu2 %v155_v44  ;;  %260 = vmatpush.msrb.mxu0 %v88_v45  ;;  %v136_v54 = vld [vmem:[%s909_s1 + $0x3a0] sm:$0xff]  ;;  %v86_v56 = vld [vmem:[%s909_s1 + $0x210] sm:$0xff]  ;;  %v103_v57 = vld [vmem:[%s909_s1 + $0x298] sm:$0xff] }
  0x39   :  { %279 = vmatpush.msrb.mxu1 %v105_v46  ;;  %300 = vmatpush.msrb.mxu2 %v120_v47  ;;  %v118_v58 = vld [vmem:[%s909_s1 + $0x310] sm:$0xff]  ;;  %v135_v59 = vld [vmem:[%s909_s1 + $0x398] sm:$0xff]  ;;  %v85_v60 = vld [vmem:[%s909_s1 + $0x208] sm:$0xff]  ;;  %v397_v46 = vlaneseq }
  0x3a   :  { %319 = vmatpush.msrb.mxu3 %v137_v48  ;;  %185 = vmatmul.f32.vlgmr.msra.gmra.mxu0 %v153_v49  ;;  %v102_v61 = vld [vmem:[%s909_s1 + $0x290] sm:$0xff]  ;;  %v117_v62 = vld [vmem:[%s909_s1 + $0x308] sm:$0xff]  ;;  %v84_v0 = vld [vmem:[%s909_s1 + $0x200] sm:$0xff] }
  0x3b   :  { %245 = vmatmul.f32.vlgmr.msra.gmra.mxu3 %v156_v50  ;;  %261 = vmatpush.msrb.mxu0 %v87_v51  ;;  %v134_v63 = vld [vmem:[%s909_s1 + $0x390] sm:$0xff]  ;;  %v101_v1 = vld [vmem:[%s909_s1 + $0x288] sm:$0xff]  ;;  %v116_v2 = vld [vmem:[%s909_s1 + $0x300] sm:$0xff]  ;;  %v398_v47 = vand.u32 127, %v397_v46 }
  0x3c   :  { %280 = vmatpush.msrb.mxu1 %v104_v52  ;;  %301 = vmatpush.msrb.mxu2 %v119_v53  ;;  %v133_v3 = vld [vmem:[%s909_s1 + $0x388] sm:$0xff]  ;;  %v157_v4 = vld.sshfl [vmem:[#allocation1 + $0x20] sm:$0xff pattern:$0x73625140]  ;;  %v372_v30 = vld [vmem:[%s911_s3 + $0x18] sm:$0xff] }
  0x3d   :  { %320 = vmatpush.msrb.mxu3 %v136_v54  ;;  %205 = vmatmul.f32.vlgmr.msra.gmra.mxu1 %v154_v55  ;;  %v159_v5 = vld.sshfl [vmem:[#allocation1 + $0x30] sm:$0xff pattern:$0x73625140]  ;;  %v100_v6 = vld [vmem:[%s909_s1 + $0x280] sm:$0xff]  ;;  %v370_v32 = vld [vmem:[%s911_s3 + $0x8] sm:$0xff] }
  0x3e   :  { %262 = vmatpush.msrb.mxu0 %v86_v56  ;;  %281 = vmatpush.msrb.mxu1 %v103_v57  ;;  %v132_v7 = vld [vmem:[%s909_s1 + $0x380] sm:$0xff]  ;;  %v158_v8 = vld.sshfl [vmem:[#allocation1 + $0x28] sm:$0xff pattern:$0x73625140]  ;;  %v371_v31 = vld [vmem:[%s911_s3 + $0x10] sm:$0xff] }
  0x3f   :  { %302 = vmatpush.msrb.mxu2 %v118_v58  ;;  %321 = vmatpush.msrb.mxu3 %v135_v59  ;;  %v160_v9 = vld.sshfl [vmem:[#allocation1 + $0x38] sm:$0xff pattern:$0x73625140]  ;;  %v444_v25 = vld [vmem:[%s910_s2] ss:$0 sm:$0xff] }
  0x40   :  { %263 = vmatpush.msrb.mxu0 %v85_v60  ;;  %282 = vmatpush.msrb.mxu1 %v102_v61  ;;  %v369_v33 = vld [vmem:[%s911_s3] sm:$0xff]  ;;  %s473_s3 = smov [#allocation3]  }
  0x41   :  { %303 = vmatpush.msrb.mxu2 %v117_v62  ;;  %322 = vmatpush.msrb.mxu3 %v134_v63  ;;  %s429_s20 = sshll.u32 %s473_s3, 4  ;;  %v474_v62 = vmov 0.0   ;;  %s430_s20 = int_to_ptr.vmem [resolvable:$true] %s429_s20 }
  0x42   :  { %264 = vmatpush.msrb.mxu0 %v84_v0  ;;  %283 = vmatpush.msrb.mxu1 %v101_v1 }
  0x43   :  { %304 = vmatpush.msrb.mxu2 %v116_v2  ;;  %323 = vmatpush.msrb.mxu3 %v133_v3 }
  0x44   :  { %265 = vmatmul.f32.vlgmr.msrb.gmra.mxu0 %v157_v4  ;;  %305 = vmatmul.f32.vlgmr.msrb.gmra.mxu2 %v159_v5 }
  0x45   :  { %284 = vmatpush.msrb.mxu1 %v100_v6  ;;  %324 = vmatpush.msrb.mxu3 %v132_v7 }
  0x46   :  { %285 = vmatmul.f32.vlgmr.msrb.gmra.mxu1 %v158_v8  ;;  %325 = vmatmul.f32.vlgmr.msrb.gmra.mxu3 %v160_v9 }
  0x47   :  { %389 = vmatpush.msra.mxu0 %v372_v30 }
  0x49   :  { %390 = vmatpush.msra.mxu0 %v371_v31 }
  0x4b   :  { %391 = vmatpush.msra.mxu0 %v370_v32 }
  0x4d   :  { %392 = vmatpush.msra.mxu0 %v369_v33 }
  0xb7   :  { %v186_v10 = vpop.f32.mrf.mxu0 }
  0xba   :  { %v206_v11 = vpop.f32.mrf.mxu1 }
  0xbb   :  { %v207_v12 = vadd.f32 %v206_v11, %v186_v10  ;;  %v226_v13 = vpop.f32.mrf.mxu2 }
  0xbd   :  { %v227_v14 = vadd.f32 %v226_v13, %v207_v12 }
  0xbe   :  { %v246_v15 = vpop.f32.mrf.mxu3 }
  0xbf   :  { %v247_v16 = vadd.f32 %v246_v15, %v227_v14 }
  0xc1   :  { %v266_v17 = vpop.f32.mrf.mxu0 }
  0xc2   :  { %v267_v18 = vadd.f32 %v266_v17, %v247_v16 }
  0xc3   :  { %v286_v19 = vpop.f32.mrf.mxu1 }
  0xc4   :  { %v287_v20 = vadd.f32 %v286_v19, %v267_v18 }
  0xc7   :  { %v306_v21 = vpop.f32.mrf.mxu2 }
  0xc8   :  { %v307_v22 = vadd.f32 %v306_v21, %v287_v20 }
  0xc9   :  { %v326_v23 = vpop.f32.mrf.mxu3 }
  0xca   :  { %v327_v24 = vadd.f32 %v326_v23, %v307_v22 }
  0xcc   :  { %334 = vst.msk [vmem:[#allocation2] sm:$0x3] %vm333_vm0, %v327_v24 }
  0xd3   :  { %v346_v26 = vld [vmem:[#allocation2] sm:$0x3] }
  0xd4   :  { %v351_v27 = vadd.f32 %v444_v25, %v346_v26 }
  0xd6   :  { %v352_v28 = vmul.f32 %v351_v27, %v351_v27 }
  0xd8   :  { %v354_v29 = vsel %vm333_vm0, %v352_v28, 0.0 }
  0xd9   :  { %355 = vadd.xlane.f32.xlu0 %v354_v29 }
 0x14c   :  { %v356_v34 = vpop.xlane.xlu0 %355 }
 0x14d   :  { %v357_v35 = vmax.f32 %v356_v34, 1e-24 }
 0x14f   :  { %445 = vrsqrt.f32 %v357_v35  ;;  %vm364_vm2 = vweird.f32 %v357_v35 }
 0x155   :  { %v446_v36 = vpop.eup %445 }
 0x156   :  { %v359_v37 = vmul.f32 %v446_v36, %v357_v35  ;;  %vm365_vm1 = vweird.f32 %v446_v36 }
 0x157   :  { %vm366_vm3 = vmor %vm364_vm2, %vm365_vm1 }
 0x158   :  { %v360_v38 = vmul.f32 %v446_v36, %v359_v37 }
 0x15a   :  { %v361_v39 = vmul.f32 0.5, %v360_v38 }
 0x15c   :  { %v362_v40 = vsub.f32 1.5, %v361_v39 }
 0x15e   :  { %v363_v41 = vmul.f32 %v446_v36, %v362_v40 }
 0x160   :  { %v367_v42 = vsel %vm366_vm3, %v446_v36, %v363_v41 }
 0x161   :  { %v368_v43 = vmul.f32 %v367_v42, %v351_v27 }
 0x163   :  { %440 = vmatmul.msk.f32.vlgmr.msra.gmra.mxu0 %vm373_vm4, %v368_v43 }
 0x1e0   :  { %v394_v44 = vpop.f32.mrf.mxu0 }
 0x1e1   :  { %v400_v45 = vsel %vm399_vm5, %v394_v44, -inf }
 0x1e2   :  { %401 = vmax.xlane.f32.xlu0 %v400_v45 }
 0x255   :  { %v402_v48 = vpop.xlane.xlu0 %401 }
 0x256   :  { %vm403_vm6 = vcmp.eq.f32.partialorder %v394_v44, %v402_v48 }
 0x257   :  { %v404_v49 = vsel %vm403_vm6, %v398_v47, 6 }
 0x258   :  { %v405_v50 = vsel %vm399_vm5, %v404_v49, 2147483647 }
 0x259   :  { %v407_v51 = vshra.s32 %v405_v50, 16  ;;  %v406_v53 = vand.u32 65535, %v405_v50 }
 0x25b   :  { %v409_v52 = vcvt.s32.f32 %v407_v51  ;;  %v408_v55 = vcvt.s32.f32 %v406_v53 }
 0x25d   :  { %410 = vmin.xlane.f32.xlu1 %v409_v52 }
 0x2d0   :  { %v411_v54 = vpop.xlane.xlu1 %410 }
 0x2d1   :  { %vm412_vm7 = vcmp.eq.f32.partialorder %v409_v52, %v411_v54  ;;  %v417_v57 = vcvt.f32.s32 %v411_v54 }
 0x2d2   :  { %v413_v56 = vsel %vm412_vm7, %v408_v55, inf }
 0x2d3   :  { %414 = vmin.xlane.f32.xlu1 %v413_v56  ;;  %v418_v59 = vshll.u32 %v417_v57, 16 }
 0x346   :  { %v415_v58 = vpop.xlane.xlu1 %414 }
 0x347   :  { %v416_v60 = vcvt.f32.s32 %v415_v58 }
 0x349   :  { %v419_v61 = vadd.s32 %v418_v59, %v416_v60 }
 0x34b   :  { %vm420_vm8 = vcmp.eq.s32.totalorder %v398_v47, %v419_v61 }
 0x34c   :  { %v441_v63 = vsel %vm420_vm8, 1.0, %v474_v62 }
 0x34d   :  { %423 = vst [vmem:[#allocation3] sm:$0x3] %v441_v63 }
 0x34e   :  { %434 = dma.vmem_to_hbm [thread:$0]  %s430_s20, 32, %s432_s23, [#allocation4]  }
 0x34f   :  { %471 = dma.done.wait [#allocation4], 32  }
 0x350   :  { %472 = vsyncadd [#allocation4], 4294967264 }
 0x351   :  { %439 = vsyncpa [#allocation4], 1 }

</bundles_post_ra>
